<compile_context>
chip_gen: v7x
topology: tpu7x:2x2x1
jax: 0.10.0
libtpu: 0.0.40
codegen_flags: <defaults>
</compile_context>

<pallas_src>
import functools

import jax
import jax.numpy as jnp
from jax.experimental import pallas as pl
from jax.experimental.pallas import tpu as pltpu


# ---------------------------------------------------------------------------
# helpers
# ---------------------------------------------------------------------------
def _round_up(x, m):
    return ((x + m - 1) // m) * m


def _pad2(x, rows, cols):
    r, c = x.shape
    return jnp.pad(x, ((0, rows - r), (0, cols - c)))


_VMEM = pl.BlockSpec(memory_space=pltpu.MemorySpace.VMEM)


# ---------------------------------------------------------------------------
# L2 row normalization (tiled over entity rows)
# ---------------------------------------------------------------------------
def _l2norm_kernel(x_ref, o_ref):
    x = x_ref[...]
    nrm = jnp.sqrt(jnp.sum(x * x, axis=-1, keepdims=True))
    o_ref[...] = x / jnp.maximum(nrm, 1e-12)


def l2_normalize(x, tn):
    n, hp = x.shape
    return pl.pallas_call(
        _l2norm_kernel,
        out_shape=jax.ShapeDtypeStruct((n, hp), jnp.float32),
        grid_spec=pltpu.PrefetchScalarGridSpec(
            num_scalar_prefetch=0, grid=(n // tn,),
            in_specs=[pl.BlockSpec((tn, hp), lambda i: (i, 0))],
            out_specs=pl.BlockSpec((tn, hp), lambda i: (i, 0))),
        compiler_params=pltpu.CompilerParams(dimension_semantics=("parallel",)),
    )(x.astype(jnp.float32))


# ---------------------------------------------------------------------------
# per-relation average of entity embeddings (tiled accumulation over pairs)
# ---------------------------------------------------------------------------
def _rel_avg_kernel(rel_ref, mask_ref, h_ref, o_ref, acc_ref, cnt_ref, *, r2p):
    k = pl.program_id(0)

    @pl.when(k == 0)
    def _():
        acc_ref[...] = jnp.zeros_like(acc_ref)
        cnt_ref[...] = jnp.zeros_like(cnt_ref)

    rel = rel_ref[...]                                              # [1, TP] int32
    rel_ids = jax.lax.broadcasted_iota(jnp.int32, (r2p, rel.shape[1]), 0)
    onehot = (rel == rel_ids).astype(jnp.float32) * mask_ref[...]   # dedup mask
    acc_ref[...] += jnp.dot(onehot.astype(jnp.bfloat16), h_ref[...],
                            preferred_element_type=jnp.float32)
    cnt_ref[...] += jnp.sum(onehot, axis=1, keepdims=True)

    @pl.when(k == pl.num_programs(0) - 1)
    def _():
        o_ref[...] = acc_ref[...] / jnp.maximum(cnt_ref[...], 1.0)


def relation_average(edge, h, r2, r2p, hp):
    """Average entity embedding per relation over unique (entity, rel) pairs.

    Matches torch: er = unique(cat([edge[:,[0,1]], edge[:,[2,1]]])); scatter-add
    of h[er[:,0]] grouped by er[:,1] / counts. Absent relations stay zero.
    """
    ent = jnp.concatenate([edge[:, 0], edge[:, 2]]).astype(jnp.int32)
    rel = jnp.concatenate([edge[:, 1], edge[:, 1]]).astype(jnp.int32)
    p = ent.shape[0]
    # O(P log P) sort-based dedup of (entity, rel) pairs.
    key = ent * jnp.int32(r2) + rel   # TODO(synk): int32 key may overflow for huge N*2R
    perm = jnp.argsort(key)
    key_s = key[perm]
    is_first = jnp.concatenate(
        [jnp.ones((1,), jnp.bool_), key_s[1:] != key_s[:-1]]).astype(jnp.float32)
    ent_s = ent[perm]
    rel_s = rel[perm]
    hg = h[ent_s].astype(jnp.bfloat16)                              # [P, hp]

    tp = 512 if p >= 512 else _round_up(p, 128)
    pp = _round_up(p, tp)
    hg = jnp.pad(hg, ((0, pp - p), (0, 0)))
    rel_s = jnp.pad(rel_s, (0, pp - p), constant_values=-1).reshape(1, pp)
    mask = jnp.pad(is_first, (0, pp - p)).reshape(1, pp)

    kern = functools.partial(_rel_avg_kernel, r2p=r2p)
    return pl.pallas_call(
        kern,
        out_shape=jax.ShapeDtypeStruct((r2p, hp), jnp.float32),
        grid_spec=pltpu.PrefetchScalarGridSpec(
            num_scalar_prefetch=0, grid=(pp // tp,),
            in_specs=[pl.BlockSpec((1, tp), lambda k: (0, k)),
                      pl.BlockSpec((1, tp), lambda k: (0, k)),
                      pl.BlockSpec((tp, hp), lambda k: (k, 0))],
            out_specs=pl.BlockSpec((r2p, hp), lambda k: (0, 0)),
            scratch_shapes=[pltpu.VMEM((r2p, hp), jnp.float32),
                            pltpu.VMEM((r2p, 1), jnp.float32)]),
        compiler_params=pltpu.CompilerParams(dimension_semantics=("arbitrary",)),
    )(rel_s, mask, hg)


# ---------------------------------------------------------------------------
# fused GRU cell (2 lane-dense matmuls) + optional L2 norm epilogue
# ---------------------------------------------------------------------------
def _gru_kernel(x_ref, h_ref, wi_ref, wh_ref, bi_ref, bh_ref, o_ref, *, hp, do_norm):
    x = x_ref[...].astype(jnp.bfloat16)
    h = h_ref[...]
    gi = jnp.dot(x, wi_ref[...], preferred_element_type=jnp.float32) + bi_ref[...]
    gh = jnp.dot(h.astype(jnp.bfloat16), wh_ref[...],
                 preferred_element_type=jnp.float32) + bh_ref[...]
    r = jax.nn.sigmoid(gi[:, 0:hp] + gh[:, 0:hp])
    z = jax.nn.sigmoid(gi[:, hp:2 * hp] + gh[:, hp:2 * hp])
    n = jnp.tanh(gi[:, 2 * hp:3 * hp] + r * gh[:, 2 * hp:3 * hp])
    out = (1.0 - z) * n + z * h
    if do_norm:
        nrm = jnp.sqrt(jnp.sum(out * out, axis=-1, keepdims=True))
        out = out / jnp.maximum(nrm, 1e-12)
    o_ref[...] = out


def gru_cell(x, h, wi, wh, bi, bh, hp, do_norm):
    kern = functools.partial(_gru_kernel, hp=hp, do_norm=do_norm)
    return pl.pallas_call(
        kern,
        out_shape=jax.ShapeDtypeStruct(h.shape, jnp.float32),
        in_specs=[_VMEM] * 6,
        out_specs=_VMEM,
    )(x, h, wi, wh, bi, bh)


# ---------------------------------------------------------------------------
# fused URGCN layer: on-the-fly one-hot scatter aggregation + mean + combine
# ---------------------------------------------------------------------------
# TODO(synk): URGCNLayer source is not provided; implemented as the standard
# RE-GCN union layer: mean-aggregated (h[src] + rel[type]) @ W_neighbor plus a
# self-loop h @ W_loop, optional ReLU activation (dropout=0 so omitted).
def _rgcn_kernel(dst_ref, msg_ref, h_ref, wn_ref, wl_ref, o_ref, acc_ref, deg_ref,
                 *, tn, active, self_loop):
    k = pl.program_id(1)

    @pl.when(k == 0)
    def _():
        acc_ref[...] = jnp.zeros_like(acc_ref)
        deg_ref[...] = jnp.zeros_like(deg_ref)

    dst = dst_ref[...]                                              # [1, TE] int32
    row0 = pl.program_id(0) * tn
    rows = jax.lax.broadcasted_iota(jnp.int32, (tn, dst.shape[1]), 0) + row0
    hit = dst == rows                                               # [TN, TE] bool
    acc_ref[...] += jnp.dot(hit.astype(jnp.bfloat16), msg_ref[...],
                            preferred_element_type=jnp.float32)
    deg_ref[...] += jnp.sum(hit.astype(jnp.float32), axis=1, keepdims=True)

    @pl.when(k == pl.num_programs(1) - 1)
    def _():
        agg = acc_ref[...] / jnp.maximum(deg_ref[...], 1.0)
        out = jnp.dot(agg.astype(jnp.bfloat16), wn_ref[...],
                      preferred_element_type=jnp.float32)
        if self_loop:
            out = out + jnp.dot(h_ref[...], wl_ref[...],
                                preferred_element_type=jnp.float32)
        if active:
            out = jnp.maximum(out, 0.0)
        o_ref[...] = out


def urgcn_layer(h, rel_embed, edge, w_n, w_l, active, self_loop, n_pad, hp, tn):
    src = edge[:, 0].astype(jnp.int32)
    rtyp = edge[:, 1].astype(jnp.int32)
    dst = edge[:, 2].astype(jnp.int32)
    e = src.shape[0]
    msg = (h[src] + rel_embed[rtyp]).astype(jnp.bfloat16)           # [E, hp]
    te = 512 if e >= 512 else _round_up(e, 128)
    ep = _round_up(e, te)
    msg = jnp.pad(msg, ((0, ep - e), (0, 0)))
    dst = jnp.pad(dst, (0, ep - e), constant_values=-1).reshape(1, ep)
    h_bf = h.astype(jnp.bfloat16)

    kern = functools.partial(_rgcn_kernel, tn=tn, active=active, self_loop=self_loop)
    return pl.pallas_call(
        kern,
        out_shape=jax.ShapeDtypeStruct((n_pad, hp), jnp.float32),
        grid_spec=pltpu.PrefetchScalarGridSpec(
            num_scalar_prefetch=0, grid=(n_pad // tn, ep // te),
            in_specs=[pl.BlockSpec((1, te), lambda i, k: (0, k)),
                      pl.BlockSpec((te, hp), lambda i, k: (k, 0)),
                      pl.BlockSpec((tn, hp), lambda i, k: (i, 0)),
                      pl.BlockSpec((hp, hp), lambda i, k: (0, 0)),
                      pl.BlockSpec((hp, hp), lambda i, k: (0, 0))],
            out_specs=pl.BlockSpec((tn, hp), lambda i, k: (i, 0)),
            scratch_shapes=[pltpu.VMEM((tn, hp), jnp.float32),
                            pltpu.VMEM((tn, 1), jnp.float32)]),
        compiler_params=pltpu.CompilerParams(
            dimension_semantics=("parallel", "arbitrary")),
    )(dst, msg, h_bf, w_n, w_l)


# ---------------------------------------------------------------------------
# fused gate update: L2-norm(cur) + sigmoid gate + convex mix (tiled over rows)
# ---------------------------------------------------------------------------
def _gate_kernel(h_ref, cur_ref, wg_ref, bg_ref, o_ref, *, do_norm):
    h = h_ref[...]
    cur = cur_ref[...]
    if do_norm:
        nrm = jnp.sqrt(jnp.sum(cur * cur, axis=-1, keepdims=True))
        cur = cur / jnp.maximum(nrm, 1e-12)
    gate = jax.nn.sigmoid(
        jnp.dot(h.astype(jnp.bfloat16), wg_ref[...],
                preferred_element_type=jnp.float32) + bg_ref[...])
    o_ref[...] = gate * cur + (1.0 - gate) * h


def gate_update(h, cur, gate_w, gate_b, tn, do_norm):
    n, hp = h.shape
    kern = functools.partial(_gate_kernel, do_norm=do_norm)
    return pl.pallas_call(
        kern,
        out_shape=jax.ShapeDtypeStruct((n, hp), jnp.float32),
        grid_spec=pltpu.PrefetchScalarGridSpec(
            num_scalar_prefetch=0, grid=(n // tn,),
            in_specs=[pl.BlockSpec((tn, hp), lambda i: (i, 0)),
                      pl.BlockSpec((tn, hp), lambda i: (i, 0)),
                      pl.BlockSpec((hp, hp), lambda i: (0, 0)),
                      pl.BlockSpec((1, hp), lambda i: (0, 0))],
            out_specs=pl.BlockSpec((tn, hp), lambda i: (i, 0))),
        compiler_params=pltpu.CompilerParams(dimension_semantics=("parallel",)),
    )(h, cur, gate_w, gate_b)


# ---------------------------------------------------------------------------
# parameter padding / GRU weight packing (wrapper-level, lane-dense layout)
# ---------------------------------------------------------------------------
def _pack_gru(g, h, hp):
    wi = jnp.zeros((2 * hp, 3 * hp), jnp.float32)
    wh = jnp.zeros((hp, 3 * hp), jnp.float32)
    bi = jnp.zeros((1, 3 * hp), jnp.float32)
    bh = jnp.zeros((1, 3 * hp), jnp.float32)
    for gi, name in enumerate(("r", "z", "n")):
        w = g[f"w_i{name}"]                       # (2H, H), (in, out) layout
        wi = wi.at[0:h, gi * hp:gi * hp + h].set(w[0:h])
        wi = wi.at[hp:hp + h, gi * hp:gi * hp + h].set(w[h:2 * h])
        wh = wh.at[0:h, gi * hp:gi * hp + h].set(g[f"w_h{name}"])
        bi = bi.at[:, gi * hp:gi * hp + h].set(g[f"b_i{name}"])
        bh = bh.at[:, gi * hp:gi * hp + h].set(g[f"b_h{name}"])
    return (wi.astype(jnp.bfloat16), wh.astype(jnp.bfloat16), bi, bh)


# ---------------------------------------------------------------------------
# forward pass (mirrors REGCNBase.forward)
# ---------------------------------------------------------------------------
def regcn_forward(params, edges, num_relation, num_layer,
                  layer_norm=True, active=False, self_loop=True):
    n, h = params["static_entity_embed"].shape
    r2 = num_relation * 2
    hp = _round_up(h, 128)
    r2p = _round_up(r2, 8)

    if n >= 512:
        tn = 512
        n_pad = _round_up(n, tn)
    else:
        n_pad = _round_up(n, 32)
        tn = n_pad

    ent0 = _pad2(params["static_entity_embed"].astype(jnp.float32), n_pad, hp)
    rel0 = _pad2(params["static_relation_embed"].astype(jnp.float32), r2p, hp)
    gate_w = _pad2(params["gate_weight"].astype(jnp.float32), hp, hp).astype(jnp.bfloat16)
    gate_b = _pad2(params["gate_bias"].reshape(1, -1).astype(jnp.float32), 1, hp)
    wi, wh, bi, bh = _pack_gru(params["gru"], h, hp)
    layer_ws = [(_pad2(lp["w_neighbor"].astype(jnp.float32), hp, hp).astype(jnp.bfloat16),
                 _pad2(lp["w_loop"].astype(jnp.float32), hp, hp).astype(jnp.bfloat16))
                for lp in params["rgcn_layers"]]

    evolved_entity = l2_normalize(ent0, tn) if layer_norm else ent0
    evolved_relation = rel0

    for edge in edges:
        cur_rel = relation_average(edge, evolved_entity, r2, r2p, hp)    # [2Rp, hp]
        gru_x = jnp.concatenate([rel0, cur_rel], axis=1)                 # [2Rp, 2hp]
        evolved_relation = gru_cell(gru_x, evolved_relation,
                                    wi, wh, bi, bh, hp, layer_norm)

        cur = evolved_entity
        for (w_n, w_l) in layer_ws:
            cur = urgcn_layer(cur, evolved_relation, edge, w_n, w_l,
                              active, self_loop, n_pad, hp, tn)

        evolved_entity = gate_update(evolved_entity, cur,
                                     gate_w, gate_b, tn, layer_norm)

    if layer_norm:
        evolved_entity = l2_normalize(evolved_entity, tn)
    return evolved_entity[:n, :h], evolved_relation[:r2, :h]


# ---------------------------------------------------------------------------
# deterministic parameter init (shapes follow REGCNBase.__init__)
# ---------------------------------------------------------------------------
def init_params(key, num_entity, num_relation, hidden_dim, num_layer):
    h = hidden_dim
    r2 = num_relation * 2
    ks = jax.random.split(key, 17 + 2 * num_layer)

    def xavier_normal(k, shape):
        fan_out, fan_in = shape
        std = (2.0 / (fan_in + fan_out)) ** 0.5
        return std * jax.random.normal(k, shape, jnp.float32)

    def xavier_uniform(k, shape, gain=1.0):
        fan_out, fan_in = shape
        bound = gain * (6.0 / (fan_in + fan_out)) ** 0.5
        return jax.random.uniform(k, shape, jnp.float32, -bound, bound)

    kg = 1.0 / (h ** 0.5)

    def u(k, shape):
        return jax.random.uniform(k, shape, jnp.float32, -kg, kg)

    params = {
        "static_entity_embed": jax.random.normal(ks[0], (num_entity, h), jnp.float32),
        "static_relation_embed": xavier_normal(ks[1], (r2, h)),
        "w1": xavier_normal(ks[2], (h, h)),   # defined in __init__ but unused in forward
        "w2": xavier_normal(ks[3], (h, h)),   # defined in __init__ but unused in forward
        "gate_weight": xavier_uniform(ks[4], (h, h), gain=2.0 ** 0.5),
        "gate_bias": jnp.zeros((1, h), jnp.float32),
        # GRUCell(input=2H, hidden=H); weights stored pre-transposed as (in, out).
        "gru": {
            "w_ir": u(ks[5], (2 * h, h)), "w_iz": u(ks[6], (2 * h, h)),
            "w_in": u(ks[7], (2 * h, h)),
            "w_hr": u(ks[8], (h, h)), "w_hz": u(ks[9], (h, h)), "w_hn": u(ks[10], (h, h)),
            "b_ir": u(ks[11], (1, h)), "b_iz": u(ks[12], (1, h)), "b_in": u(ks[13], (1, h)),
            "b_hr": u(ks[14], (1, h)), "b_hz": u(ks[15], (1, h)), "b_hn": u(ks[16], (1, h)),
        },
        "rgcn_layers": [
            {
                "w_neighbor": xavier_normal(ks[17 + 2 * i], (h, h)),
                "w_loop": xavier_normal(ks[17 + 2 * i + 1], (h, h)),
            }
            for i in range(num_layer)
        ],
    }
    return params


# ---------------------------------------------------------------------------
if __name__ == "__main__":
    num_entity = 32
    num_relation = 4
    hidden_dim = 32
    seq_len = 2
    num_layer = 2
    num_edges = 16

    key = jax.random.PRNGKey(0)
    pkey, ekey = jax.random.split(key)
    params = init_params(pkey, num_entity, num_relation, hidden_dim, num_layer)

    edges = []
    ekeys = jax.random.split(ekey, seq_len)
    for t in range(seq_len):
        k1, k2, k3 = jax.random.split(ekeys[t], 3)
        src = jax.random.randint(k1, (num_edges,), 0, num_entity)
        rel = jax.random.randint(k2, (num_edges,), 0, 2 * num_relation)
        dst = jax.random.randint(k3, (num_edges,), 0, num_entity)
        edges.append(jnp.stack([src, rel, dst], axis=1).astype(jnp.int32))

    ent_embed, rel_embed = regcn_forward(
        params, edges, num_relation, num_layer,
        layer_norm=True, active=False, self_loop=True)
    jax.block_until_ready((ent_embed, rel_embed))

    assert ent_embed.shape == (num_entity, hidden_dim)
    assert rel_embed.shape == (2 * num_relation, hidden_dim)
    assert bool(jnp.all(jnp.isfinite(ent_embed)))
    assert bool(jnp.all(jnp.isfinite(rel_embed)))
    print("KERNEL_OK")
</pallas_src>

<mosaic_0001>
module attributes {stable_mosaic.version = 11 : i64} {
  func.func @_l2norm_kernel(%arg0: i32, %arg1: memref<32x128xf32, #tpu.memory_space<vmem>>, %arg2: memref<32x128xf32, #tpu.memory_space<vmem>>) attributes {dimension_semantics = [#tpu.dimension_semantics<parallel>], iteration_bounds = array<i64: 1>, scalar_prefetch = 0 : i64, scratch_operands = 0 : i64, tpu.core_type = #tpu.core_type<tc>, window_params = [{transform_indices = @transform_0, window_bounds = array<i64: 32, 128>}, {transform_indices = @transform_1, window_bounds = array<i64: 32, 128>}]} {
    %c0 = arith.constant 0 : index
    %c0_0 = arith.constant 0 : index
    %0 = vector.load %arg1[%c0, %c0_0] : memref<32x128xf32, #tpu.memory_space<vmem>>, vector<32x128xf32>
    %1 = arith.mulf %0, %0 : vector<32x128xf32>
    %cst = arith.constant dense<0.000000e+00> : vector<32xf32>
    %2 = vector.multi_reduction <add>, %1, %cst [1] : vector<32x128xf32> to vector<32xf32>
    %3 = vector.shape_cast %2 : vector<32xf32> to vector<32x1xf32>
    %4 = math.sqrt %3 : vector<32x1xf32>
    %cst_1 = arith.constant 9.99999996E-13 : f32
    %5 = vector.broadcast %cst_1 : f32 to vector<32x1xf32>
    %6 = arith.maximumf %4, %5 : vector<32x1xf32>
    %7 = vector.broadcast %6 : vector<32x1xf32> to vector<32x128xf32>
    %8 = arith.divf %0, %7 : vector<32x128xf32>
    %c0_2 = arith.constant 0 : index
    %c0_3 = arith.constant 0 : index
    %9 = vector.load %arg2[%c0_2, %c0_3] : memref<32x128xf32, #tpu.memory_space<vmem>>, vector<32x128xf32>
    tpu.vector_store %arg2[%c0_2, %c0_3], %8 {strides = array<i32>} : memref<32x128xf32, #tpu.memory_space<vmem>>, vector<32x128xf32>,
    return
  }
  func.func @transform_0(%arg0: i32) -> (i32, i32) {
    %c0_i32 = arith.constant 0 : i32
    %c0_i32_0 = arith.constant 0 : i32
    return %arg0, %c0_i32 : i32, i32
  }
  func.func @transform_1(%arg0: i32) -> (i32, i32) {
    %c0_i32 = arith.constant 0 : i32
    %c0_i32_0 = arith.constant 0 : i32
    return %arg0, %c0_i32 : i32, i32
  }
}

</mosaic_0001>

<bundles_post_ra>
// kernel: tpu_custom_call.1
= control target key start
LH: loop header
LB: loop body
LE: loop exit
PB: predicated region body
PF: predicated region fallthrough
CT: control target
= control target key end

     0   :  { %6 = vsyncpa [#allocation3], 0  ;;  %s217_s0 = inlined_call_operand.hbm [shape: f32[32,128], index: 0, kind: input, shape index: {}]   ;;  %s218_s1 = inlined_call_operand.hbm [shape: f32[32,128], index: 1, kind: output, shape index: {}]  }
   0x1   :  { %7 = vsyncpa [#allocation4], 0  ;;  %s168_s6 = smov [#allocation2]   ;;  %s120_s10 = scalar_lea.hbm %s217_s0, 512 }
   0x2   :  { %s13_s7 = sshll.u32 %s168_s6, 4  ;;  %p121_p0 = scmp.ne.s32.totalorder %s217_s0, %s120_s10  ;;  %s14_s7 = int_to_ptr.vmem [resolvable:$true] %s13_s7 }
   0x3   :  { %p124_p1 = scmp.lt.u32.totalorder %s120_s10, %s217_s0 }
   0x5   :  { %p126_p2 = pnand %p124_p1, %p121_p0 }
   0x7   :  { %129 = shalt.err (!%p126_p2)
}
   0x8   :  { %s130_s15 = scalar_lea.vmem %s14_s7, 512  ;;  %p135_p4 = scmp.lt.s32.totalorder %s14_s7, %s14_s7 }
   0x9   :  { %p131_p3 = scmp.ne.s32.totalorder %s14_s7, %s130_s15  ;;  %p136_p5 = scmp.lt.s32.totalorder %s130_s15, %s130_s15 }
   0xb   :  { %p137_p6 = por %p136_p5, %p135_p4 }
   0xd   :  { %p138_p7 = pnand %p137_p6, %p131_p3 }
   0xf   :  { %141 = shalt.err (!%p138_p7)
}
  0x10   :  { %s169_s16 = smov 128   ;;  %s170_s17 = smov 8  }
  0x11   :  { %19 = dma.hbm_to_vmem [thread:$0]  %s217_s0, 512, %s14_s7, [#allocation3], %s169_s16, %s169_s16, %s170_s17  }
  0x12   :  { %164 = dma.done.wait [#allocation3], 512  }
  0x13   :  { %165 = vsyncadd [#allocation3], 4294966784  ;;  %v25_v0 = vld [vmem:[#allocation2 + $0x10] sm:$0xff]  ;;  %v23_v1 = vld [vmem:[#allocation2] sm:$0xff]  ;;  %s171_s0 = smov [#allocation5]  }
  0x14   :  { %v197_v2 = vld [vmem:[#allocation2 + $0x18] sm:$0xff]  ;;  %v29_v3 = vmul.f32 %v25_v0, %v25_v0  ;;  %v27_v4 = vmul.f32 %v23_v1, %v23_v1  ;;  %v24_v5 = vld [vmem:[#allocation2 + $0x8] sm:$0xff]  ;;  %s88_s20 = sshll.u32 %s171_s0, 4  ;;  %s89_s20 = int_to_ptr.vmem [resolvable:$true] %s88_s20 }
  0x15   :  { %v30_v6 = vmul.f32 %v197_v2, %v197_v2  ;;  %v28_v7 = vmul.f32 %v24_v5, %v24_v5  ;;  %s142_s21 = scalar_lea.vmem %s89_s20, 512  ;;  %p147_p9 = scmp.lt.s32.totalorder %s89_s20, %s89_s20 }
  0x16   :  { %35 = vadd.xlane.f32.xlu1 %v29_v3  ;;  %31 = vadd.xlane.f32.xlu0 %v27_v4  ;;  %p143_p8 = scmp.ne.s32.totalorder %s89_s20, %s142_s21  ;;  %p148_p10 = scmp.lt.s32.totalorder %s142_s21, %s142_s21 }
  0x18   :  { %p149_p11 = por %p148_p10, %p147_p9 }
  0x1a   :  { %37 = vadd.xlane.f32.xlu1 %v30_v6  ;;  %33 = vadd.xlane.f32.xlu0 %v28_v7  ;;  %p150_p12 = pnand %p149_p11, %p143_p8 }
  0xa3   :  { %v36_v8 = vpop.xlane.xlu1 %35  ;;  %v32_v9 = vpop.xlane.xlu0 %31 }
  0xa4   :  { %104 = vrsqrt.f32 %v36_v8  ;;  %vm55_vm0 = vcmp.eq.f32.partialorder %v36_v8, inf  ;;  %v58_v15 = vand.u32 2147483648, %v36_v8  ;;  %vm57_vm1 = vcmp.eq.f32.partialorder %v36_v8, 0.0 }
  0xa5   :  { %106 = vrsqrt.f32 %v32_v9  ;;  %vm41_vm2 = vcmp.eq.f32.partialorder %v32_v9, inf  ;;  %v44_v18 = vand.u32 2147483648, %v32_v9  ;;  %vm43_vm3 = vcmp.eq.f32.partialorder %v32_v9, 0.0 }
  0xa7   :  { %v38_v10 = vpop.xlane.xlu1 %37  ;;  %v34_v11 = vpop.xlane.xlu0 %33 }
  0xa8   :  { %108 = vrsqrt.f32 %v38_v10  ;;  %vm62_vm4 = vcmp.eq.f32.partialorder %v38_v10, inf  ;;  %vm64_vm5 = vcmp.eq.f32.partialorder %v38_v10, 0.0  ;;  %v65_v27 = vand.u32 2147483648, %v38_v10 }
  0xa9   :  { %110 = vrsqrt.f32 %v34_v11  ;;  %vm48_vm6 = vcmp.eq.f32.partialorder %v34_v11, inf  ;;  %v51_v30 = vand.u32 2147483648, %v34_v11  ;;  %vm50_vm7 = vcmp.eq.f32.partialorder %v34_v11, 0.0 }
  0xae   :  { %v105_v12 = vpop.eup %104 }
  0xaf   :  { %v107_v13 = vpop.eup %106  ;;  %v54_v14 = vmul.f32 %v105_v12, %v36_v8 }
  0xb0   :  { %v40_v16 = vmul.f32 %v107_v13, %v32_v9 }
  0xb1   :  { %v56_v17 = vsel %vm55_vm0, %v36_v8, %v54_v14 }
  0xb2   :  { %v109_v19 = vpop.eup %108  ;;  %v59_v20 = vsel %vm57_vm1, %v58_v15, %v56_v17  ;;  %v42_v21 = vsel %vm41_vm2, %v32_v9, %v40_v16 }
  0xb3   :  { %v111_v22 = vpop.eup %110  ;;  %v69_v23 = vmax.f32 %v59_v20, 1e-12  ;;  %v45_v24 = vsel %vm43_vm3, %v44_v18, %v42_v21  ;;  %v61_v25 = vmul.f32 %v109_v19, %v38_v10 }
  0xb4   :  { %v67_v26 = vmax.f32 %v45_v24, 1e-12  ;;  %v47_v28 = vmul.f32 %v111_v22, %v34_v11 }
  0xb5   :  { %112 = vrcp.f32 %v69_v23  ;;  %v63_v29 = vsel %vm62_vm4, %v38_v10, %v61_v25 }
  0xb6   :  { %114 = vrcp.f32 %v67_v26  ;;  %v66_v31 = vsel %vm64_vm5, %v65_v27, %v63_v29  ;;  %v49_v32 = vsel %vm48_vm6, %v34_v11, %v47_v28 }
  0xb7   :  { %v70_v33 = vmax.f32 %v66_v31, 1e-12  ;;  %v52_v34 = vsel %vm50_vm7, %v51_v30, %v49_v32 }
  0xb8   :  { %v68_v35 = vmax.f32 %v52_v34, 1e-12 }
  0xb9   :  { %116 = vrcp.f32 %v70_v33 }
  0xba   :  { %118 = vrcp.f32 %v68_v35 }
  0xbf   :  { %v113_v36 = vpop.eup %112 }
  0xc0   :  { %v115_v37 = vpop.eup %114  ;;  %v76_v38 = vmul.f32 %v113_v36, %v25_v0 }
  0xc1   :  { %v72_v39 = vmul.f32 %v115_v37, %v23_v1 }
  0xc2   :  { %81 = vst [vmem:[#allocation5 + $0x10] sm:$0xff] %v76_v38 }
  0xc3   :  { %v117_v40 = vpop.eup %116  ;;  %79 = vst [vmem:[#allocation5] sm:$0xff] %v72_v39 }
  0xc4   :  { %v119_v41 = vpop.eup %118  ;;  %v78_v42 = vmul.f32 %v117_v40, %v197_v2 }
  0xc5   :  { %v74_v43 = vmul.f32 %v119_v41, %v24_v5 }
  0xc6   :  { %82 = vst [vmem:[#allocation5 + $0x18] sm:$0xff] %v78_v42 }
  0xc7   :  { %80 = vst [vmem:[#allocation5 + $0x8] sm:$0xff] %v74_v43 }
  0xc8   :  { %153 = shalt.err (!%p150_p12)
}
  0xc9   :  { %s154_s24 = scalar_lea.hbm %s218_s1, 512 }
  0xca   :  { %p155_p13 = scmp.ne.s32.totalorder %s218_s1, %s154_s24  ;;  %p158_p0 = scmp.lt.u32.totalorder %s154_s24, %s218_s1 }
  0xcc   :  { %p160_p1 = pnand %p158_p0, %p155_p13 }
  0xce   :  { %163 = shalt.err (!%p160_p1)
}
  0xcf   :  { %94 = dma.vmem_to_hbm [thread:$0]  %s89_s20, 512, %s218_s1, [#allocation4], %s169_s16, %s169_s16, %s170_s17  }
  0xd0   :  { %166 = dma.done.wait [#allocation4], 512  }
  0xd1   :  { %167 = vsyncadd [#allocation4], 4294966784 }
  0xd2   :  { %98 = vsyncpa [#allocation3], 1 }
  0xd3   :  { %99 = vsyncpa [#allocation4], 1 }

</bundles_post_ra>
